<compile_context>
chip_gen: v7x
topology: tpu7x:2x2x1
jax: 0.10.0
libtpu: 0.0.40
codegen_flags: <defaults>
</compile_context>

<pallas_src>
import jax
import jax.numpy as jnp
from jax.experimental import pallas as pl
from jax.experimental.pallas import tpu as pltpu

LANE = 128  # TPU lane width: hidden / class dims are zero-padded to this.


# ----------------------------------------------------------------------------
# Single fused kernel:
#   GAT(full)+ELU, GAT(group)+ELU, adjacent-group mean, one-hot gathers,
#   fusion update, final Linear.
# ----------------------------------------------------------------------------
def _fused_forward_kernel(
    fx_ref, fadj_ref, wf_ref, af_ref, bf_ref,      # full-graph GAT inputs/params
    gx_ref, gadj_ref, wg_ref, ag_ref, bg_ref,      # group-graph GAT inputs/params
    oadj_ref, sel_ref,                             # raw g->j edges, node->group one-hot
    wfc_ref, bfc_ref,                              # final Linear (padded)
    out_ref, upd_ref):                             # outputs (lane-padded to 128)

  def gat_elu(x, adj, w, a_pair, b):
    # x:[N,F]  adj:[N,N]  w:[F,CP]  a_pair:[CP,LANE] (col0 = a_src, col1 = a_dst)
    xw = jnp.dot(x, w, preferred_element_type=jnp.float32)              # MXU [N,CP]
    # both attention scores with one MXU matmul (off the VALU/XLU slots)
    sc = jnp.dot(xw, a_pair, preferred_element_type=jnp.float32)        # MXU [N,LANE]
    src_col = sc[:, 0:1]                                                # [N,1]
    dst_col = sc[:, 1:2]                                                # [N,1]
    e = dst_col + jnp.transpose(src_col)                                # [N,N]
    e = jnp.maximum(e, 0.2 * e)                                         # leaky_relu(0.2)
    e = jnp.where(adj > 0.0, e, -1e30)                                  # mask non-edges
    m = jnp.max(e, axis=-1, keepdims=True)
    p = jnp.exp(e - m)
    denom = jnp.sum(p, axis=-1, keepdims=True)
    alpha = p * pl.reciprocal(denom, approx=True)                       # EUP reciprocal
    h = jnp.dot(alpha, xw, preferred_element_type=jnp.float32) + b      # MXU [N,CP]
    # ELU (clamp the exp argument so the unselected branch stays finite)
    return jnp.where(h > 0.0, h, jnp.exp(jnp.minimum(h, 0.0)) - 1.0)

  full_h = gat_elu(fx_ref[...], fadj_ref[...], wf_ref[...], af_ref[...], bf_ref[...])
  group_h = gat_elu(gx_ref[...], gadj_ref[...], wg_ref[...], ag_ref[...], bg_ref[...])

  # adjacent-group mean feature per group: M_g = mean_{j : g->j} group_h[j]
  oadj = oadj_ref[...]                                                   # [G,G]
  cnt = jnp.maximum(jnp.sum(oadj, axis=-1, keepdims=True), 1.0)
  adj_mean = (jnp.dot(oadj, group_h, preferred_element_type=jnp.float32)
              * pl.reciprocal(cnt, approx=True))

  # per-node gathers as one-hot matmuls on the MXU (sel[n,g]=1 iff node n in group g)
  sel = sel_ref[...]                                                     # [N,G]
  g_per_node = jnp.dot(sel, group_h, preferred_element_type=jnp.float32)
  m_per_node = jnp.dot(sel, adj_mean, preferred_element_type=jnp.float32)
  mask = jnp.sum(sel, axis=-1, keepdims=True)                            # 1 iff node in a group

  imp_g = jnp.sum(full_h * g_per_node, axis=-1, keepdims=True)
  imp_a = jnp.sum(full_h * m_per_node, axis=-1, keepdims=True)
  upd = (full_h + imp_g * g_per_node + imp_a * m_per_node) * mask        # 0 if no group

  upd_ref[...] = upd
  # masked rows give out = b_fc, matching the reference nn.Linear on zero rows
  out_ref[...] = (jnp.dot(upd, wfc_ref[...], preferred_element_type=jnp.float32)
                  + bfc_ref[...])


# ----------------------------------------------------------------------------
# Wrapper: one pallas_call for the whole forward
# ----------------------------------------------------------------------------
def build_forward(n_full, n_grp, n_feat, n_gfeat, n_hid, n_class):
  cp, kp = LANE, LANE
  spec = lambda shape: pl.BlockSpec(shape, lambda i: (0, 0))

  flops = 2 * (n_full * n_feat * cp + n_full * cp * LANE + n_full * n_full * cp
               + n_grp * n_gfeat * cp + n_grp * cp * LANE + 2 * n_grp * n_grp * cp
               + 2 * n_full * n_grp * cp + n_full * cp * kp)
  transcendentals = n_full * n_full + n_grp * n_grp + (n_full + n_grp) * cp
  bytes_accessed = 4 * (n_full * n_feat + n_full * n_full + n_feat * cp
                        + cp * LANE + cp
                        + n_grp * n_gfeat + n_grp * n_grp + n_gfeat * cp
                        + cp * LANE + cp
                        + n_grp * n_grp + n_full * n_grp
                        + cp * kp + kp
                        + n_full * kp + n_full * cp)

  fused = pl.pallas_call(
      _fused_forward_kernel,
      grid=(1,),
      in_specs=[spec((n_full, n_feat)), spec((n_full, n_full)),
                spec((n_feat, cp)), spec((cp, LANE)), spec((1, cp)),
                spec((n_grp, n_gfeat)), spec((n_grp, n_grp)),
                spec((n_gfeat, cp)), spec((cp, LANE)), spec((1, cp)),
                spec((n_grp, n_grp)), spec((n_full, n_grp)),
                spec((cp, kp)), spec((1, kp))],
      out_specs=[spec((n_full, kp)), spec((n_full, cp))],
      out_shape=[jax.ShapeDtypeStruct((n_full, kp), jnp.float32),
                 jax.ShapeDtypeStruct((n_full, cp), jnp.float32)],
      compiler_params=pltpu.CompilerParams(
          dimension_semantics=("arbitrary",),
          vmem_limit_bytes=32 * 1024 * 1024),
      cost_estimate=pl.CostEstimate(flops=flops,
                                    transcendentals=transcendentals,
                                    bytes_accessed=bytes_accessed),
  )

  @jax.jit
  def forward(padded_params, full_x, full_adj, group_x, group_adj, out_adj, sel):
    (wf, af, bf), (wg, ag, bg), (wfc, bfc) = padded_params
    out_p, upd_p = fused(full_x, full_adj, wf, af, bf,
                         group_x, group_adj, wg, ag, bg,
                         out_adj, sel, wfc, bfc)
    # strip lane padding back to model dims (tiny slices inside the same jit)
    return out_p[:, :n_class], upd_p[:, :n_hid]

  return forward


# ----------------------------------------------------------------------------
# Pure-JAX reference of the same forward (spec mirror, exact divides) for a
# correctness gate before declaring success.
# ----------------------------------------------------------------------------
def reference_forward(raw_params, full_x, full_adj, group_x, group_adj, out_adj, sel):
  (wf, asf, adf, bf), (wg, asg, adg, bg), (wfc, bfc) = raw_params

  def gat_elu(x, adj, w, a_src, a_dst, b):
    xw = x @ w                                                       # [N,H]
    src = jnp.sum(xw * a_src, axis=-1, keepdims=True)                # [N,1]
    dst = jnp.sum(xw * a_dst, axis=-1, keepdims=True)                # [N,1]
    e = dst + src.T                                                  # e[i,j]=dst[i]+src[j]
    e = jnp.where(e > 0.0, e, 0.2 * e)
    e = jnp.where(adj > 0.0, e, -1e30)
    e = e - jnp.max(e, axis=-1, keepdims=True)
    p = jnp.exp(e)
    alpha = p / jnp.sum(p, axis=-1, keepdims=True)
    h = alpha @ xw + b
    return jnp.where(h > 0.0, h, jnp.exp(jnp.minimum(h, 0.0)) - 1.0)

  full_h = gat_elu(full_x, full_adj, wf, asf, adf, bf)
  group_h = gat_elu(group_x, group_adj, wg, asg, adg, bg)

  cnt = jnp.maximum(jnp.sum(out_adj, axis=-1, keepdims=True), 1.0)
  adj_mean = (out_adj @ group_h) / cnt
  g_per_node = sel @ group_h
  m_per_node = sel @ adj_mean
  mask = jnp.sum(sel, axis=-1, keepdims=True)
  imp_g = jnp.sum(full_h * g_per_node, axis=-1, keepdims=True)
  imp_a = jnp.sum(full_h * m_per_node, axis=-1, keepdims=True)
  upd = (full_h + imp_g * g_per_node + imp_a * m_per_node) * mask
  out = upd @ wfc + bfc
  return out, upd


# ----------------------------------------------------------------------------
# Setup glue (outside the hot path): adjacency, one-hot membership, params
# ----------------------------------------------------------------------------
def _pad2d(x, rows, cols):
  r, c = x.shape
  return jnp.pad(x, ((0, rows - r), (0, cols - c)))


def edge_index_to_adj(edge_index, num_nodes, add_self_loops=True):
  src, dst = edge_index[0], edge_index[1]
  adj = jnp.zeros((num_nodes, num_nodes), jnp.float32)
  adj = adj.at[dst, src].set(1.0)            # adj[i, j] = 1 iff edge j -> i
  if add_self_loops:
    adj = jnp.minimum(adj + jnp.eye(num_nodes, dtype=jnp.float32), 1.0)
  return adj


def init_gat_params(key, in_dim, out_dim):
  k1, k2, k3 = jax.random.split(key, 3)
  sw = (2.0 / (in_dim + out_dim)) ** 0.5
  sa = (2.0 / (1 + out_dim)) ** 0.5
  w = sw * jax.random.normal(k1, (in_dim, out_dim), jnp.float32)
  a_src = sa * jax.random.normal(k2, (1, out_dim), jnp.float32)
  a_dst = sa * jax.random.normal(k3, (1, out_dim), jnp.float32)
  b = jnp.zeros((1, out_dim), jnp.float32)
  return w, a_src, a_dst, b


def pad_gat_params(p, n_hid):
  """Pad GAT params once at setup: w->[F,128], a_pair->[128,128], b->[1,128]."""
  w, a_src, a_dst, b = p
  w_p = _pad2d(w, w.shape[0], LANE)
  a_pair = jnp.zeros((LANE, LANE), jnp.float32)
  a_pair = a_pair.at[:n_hid, 0].set(a_src[0])
  a_pair = a_pair.at[:n_hid, 1].set(a_dst[0])
  b_p = _pad2d(b, 1, LANE)
  return w_p, a_pair, b_p


if __name__ == "__main__":
  # config (n_head = 1 so that fc(n_hid, n_class) is dimensionally consistent,
  # as required by the reference forward)
  cfg = dict(n_feat=8, n_group_feat=8, n_hid=32, n_head=1, n_class=4,
             n_layer_dropout=0.0, att_type="MX")
  n_full, n_grp = 16, 4

  key = jax.random.PRNGKey(0)
  k_fx, k_gx, k_p1, k_p2, k_fc = jax.random.split(key, 5)

  full_x = jax.random.normal(k_fx, (n_full, cfg["n_feat"]), jnp.float32)
  group_x = jax.random.normal(k_gx, (n_grp, cfg["n_group_feat"]), jnp.float32)

  # full graph: bidirectional ring over 16 nodes; group graph: ring over 4 groups
  sf = jnp.arange(n_full)
  full_ei = jnp.stack([jnp.concatenate([sf, (sf + 1) % n_full]),
                       jnp.concatenate([(sf + 1) % n_full, sf])])
  sg = jnp.arange(n_grp)
  group_ei = jnp.stack([jnp.concatenate([sg, (sg + 1) % n_grp]),
                        jnp.concatenate([(sg + 1) % n_grp, sg])])

  # group membership: nodes 14, 15 belong to no group (stay zero in `updated`)
  group_nodes = [[0, 1, 2, 3], [4, 5, 6, 7], [8, 9, 10, 11], [12, 13]]
  sel = jnp.zeros((n_full, n_grp), jnp.float32)
  for gi, nodes in enumerate(group_nodes):
    for nd in nodes:
      sel = sel.at[nd, gi].set(1.0)

  full_adj = edge_index_to_adj(full_ei, n_full)                 # with self-loops (GAT)
  grp_adj = edge_index_to_adj(group_ei, n_grp)                  # with self-loops (GAT)
  out_adj = jnp.zeros((n_grp, n_grp), jnp.float32).at[
      group_ei[0], group_ei[1]].set(1.0)                        # raw g->j edges

  # parameters (raw), then lane-padded once at setup (no per-call XLA padding)
  raw_f = init_gat_params(k_p1, cfg["n_feat"], cfg["n_hid"])
  raw_g = init_gat_params(k_p2, cfg["n_group_feat"], cfg["n_hid"])
  kw, kb = jax.random.split(k_fc)
  w_fc = (1.0 / cfg["n_hid"] ** 0.5) * jax.random.normal(
      kw, (cfg["n_hid"], cfg["n_class"]), jnp.float32)
  b_fc = (1.0 / cfg["n_hid"] ** 0.5) * jax.random.normal(
      kb, (1, cfg["n_class"]), jnp.float32)

  raw_params = (raw_f, raw_g, (w_fc, b_fc))
  params = (pad_gat_params(raw_f, cfg["n_hid"]),
            pad_gat_params(raw_g, cfg["n_hid"]),
            (_pad2d(w_fc, LANE, LANE), _pad2d(b_fc, 1, LANE)))

  forward = build_forward(n_full, n_grp, cfg["n_feat"], cfg["n_group_feat"],
                          cfg["n_hid"], cfg["n_class"])
  out, updated = forward(params, full_x, full_adj, group_x, grp_adj, out_adj, sel)
  jax.block_until_ready((out, updated))

  assert out.shape == (n_full, cfg["n_class"])
  assert updated.shape == (n_full, cfg["n_hid"])
  assert bool(jnp.all(jnp.isfinite(out))) and bool(jnp.all(jnp.isfinite(updated)))

  # correctness gate vs. pure-JAX reference (tolerance covers the approx
  # reciprocal on the EUP and MXU f32 accumulation differences)
  out_r, upd_r = reference_forward(raw_params, full_x, full_adj,
                                   group_x, grp_adj, out_adj, sel)
  assert bool(jnp.allclose(out, out_r, rtol=2e-2, atol=2e-2))
  assert bool(jnp.allclose(updated, upd_r, rtol=2e-2, atol=2e-2))

  print("KERNEL_OK")
</pallas_src>

<mosaic_0001>
module attributes {stable_mosaic.version = 11 : i64} {
  func.func @_fused_forward_kernel(%arg0: i32, %arg1: memref<16x8xf32, #tpu.memory_space<vmem>>, %arg2: memref<16x16xf32, #tpu.memory_space<vmem>>, %arg3: memref<8x128xf32, #tpu.memory_space<vmem>>, %arg4: memref<128x128xf32, #tpu.memory_space<vmem>>, %arg5: memref<1x128xf32, #tpu.memory_space<vmem>>, %arg6: memref<4x8xf32, #tpu.memory_space<vmem>>, %arg7: memref<4x4xf32, #tpu.memory_space<vmem>>, %arg8: memref<8x128xf32, #tpu.memory_space<vmem>>, %arg9: memref<128x128xf32, #tpu.memory_space<vmem>>, %arg10: memref<1x128xf32, #tpu.memory_space<vmem>>, %arg11: memref<4x4xf32, #tpu.memory_space<vmem>>, %arg12: memref<16x4xf32, #tpu.memory_space<vmem>>, %arg13: memref<128x128xf32, #tpu.memory_space<vmem>>, %arg14: memref<1x128xf32, #tpu.memory_space<vmem>>, %arg15: memref<16x128xf32, #tpu.memory_space<vmem>>, %arg16: memref<16x128xf32, #tpu.memory_space<vmem>>) attributes {dimension_semantics = [#tpu.dimension_semantics<arbitrary>], iteration_bounds = array<i64: 1>, scalar_prefetch = 0 : i64, scratch_operands = 0 : i64, tpu.core_type = #tpu.core_type<tc>, window_params = [{pipeline_mode = #tpu.pipeline_mode<synchronous>, transform_indices = @transform_0, window_bounds = array<i64: 16, 8>}, {pipeline_mode = #tpu.pipeline_mode<synchronous>, transform_indices = @transform_1, window_bounds = array<i64: 16, 16>}, {pipeline_mode = #tpu.pipeline_mode<synchronous>, transform_indices = @transform_2, window_bounds = array<i64: 8, 128>}, {pipeline_mode = #tpu.pipeline_mode<synchronous>, transform_indices = @transform_3, window_bounds = array<i64: 128, 128>}, {pipeline_mode = #tpu.pipeline_mode<synchronous>, transform_indices = @transform_4, window_bounds = array<i64: 1, 128>}, {pipeline_mode = #tpu.pipeline_mode<synchronous>, transform_indices = @transform_5, window_bounds = array<i64: 4, 8>}, {pipeline_mode = #tpu.pipeline_mode<synchronous>, transform_indices = @transform_6, window_bounds = array<i64: 4, 4>}, {pipeline_mode = #tpu.pipeline_mode<synchronous>, transform_indices = @transform_7, window_bounds = array<i64: 8, 128>}, {pipeline_mode = #tpu.pipeline_mode<synchronous>, transform_indices = @transform_8, window_bounds = array<i64: 128, 128>}, {pipeline_mode = #tpu.pipeline_mode<synchronous>, transform_indices = @transform_9, window_bounds = array<i64: 1, 128>}, {pipeline_mode = #tpu.pipeline_mode<synchronous>, transform_indices = @transform_10, window_bounds = array<i64: 4, 4>}, {pipeline_mode = #tpu.pipeline_mode<synchronous>, transform_indices = @transform_11, window_bounds = array<i64: 16, 4>}, {pipeline_mode = #tpu.pipeline_mode<synchronous>, transform_indices = @transform_12, window_bounds = array<i64: 128, 128>}, {pipeline_mode = #tpu.pipeline_mode<synchronous>, transform_indices = @transform_13, window_bounds = array<i64: 1, 128>}, {pipeline_mode = #tpu.pipeline_mode<synchronous>, transform_indices = @transform_14, window_bounds = array<i64: 16, 128>}, {pipeline_mode = #tpu.pipeline_mode<synchronous>, transform_indices = @transform_15, window_bounds = array<i64: 16, 128>}]} {
    %c0 = arith.constant 0 : index
    %c0_0 = arith.constant 0 : index
    %0 = vector.load %arg1[%c0, %c0_0] : memref<16x8xf32, #tpu.memory_space<vmem>>, vector<16x8xf32>
    %c0_1 = arith.constant 0 : index
    %c0_2 = arith.constant 0 : index
    %1 = vector.load %arg2[%c0_1, %c0_2] : memref<16x16xf32, #tpu.memory_space<vmem>>, vector<16x16xf32>
    %c0_3 = arith.constant 0 : index
    %c0_4 = arith.constant 0 : index
    %2 = vector.load %arg3[%c0_3, %c0_4] : memref<8x128xf32, #tpu.memory_space<vmem>>, vector<8x128xf32>
    %c0_5 = arith.constant 0 : index
    %c0_6 = arith.constant 0 : index
    %3 = vector.load %arg4[%c0_5, %c0_6] : memref<128x128xf32, #tpu.memory_space<vmem>>, vector<128x128xf32>
    %c0_7 = arith.constant 0 : index
    %c0_8 = arith.constant 0 : index
    %4 = vector.load %arg5[%c0_7, %c0_8] : memref<1x128xf32, #tpu.memory_space<vmem>>, vector<1x128xf32>
    %cst = arith.constant dense<0.000000e+00> : vector<16x128xf32>
    %5 = tpu.matmul %0, %2, %cst {dimension_numbers = #tpu.dot_dimension_numbers<[1], [0], [0], [1], [0, 0, 1, 1], [], []>} : vector<16x8xf32>, vector<8x128xf32>, vector<16x128xf32> -> vector<16x128xf32>
    %cst_9 = arith.constant dense<0.000000e+00> : vector<16x128xf32>
    %6 = tpu.matmul %5, %3, %cst_9 {dimension_numbers = #tpu.dot_dimension_numbers<[1], [0], [0], [1], [0, 0, 1, 1], [], []>} : vector<16x128xf32>, vector<128x128xf32>, vector<16x128xf32> -> vector<16x128xf32>
    %7 = vector.extract_strided_slice %6 {offsets = [0, 0], sizes = [16, 1], strides = [1, 1]} : vector<16x128xf32> to vector<16x1xf32>
    %8 = vector.extract_strided_slice %6 {offsets = [0, 1], sizes = [16, 1], strides = [1, 1]} : vector<16x128xf32> to vector<16x1xf32>
    %9 = tpu.transpose %7, [1, 0] : vector<16x1xf32> -> vector<1x16xf32>
    %10 = vector.broadcast %8 : vector<16x1xf32> to vector<16x16xf32>
    %11 = vector.broadcast %9 : vector<1x16xf32> to vector<16x16xf32>
    %12 = arith.addf %10, %11 : vector<16x16xf32>
    %cst_10 = arith.constant 2.000000e-01 : f32
    %13 = vector.broadcast %cst_10 : f32 to vector<16x16xf32>
    %14 = arith.mulf %13, %12 : vector<16x16xf32>
    %15 = arith.maximumf %12, %14 : vector<16x16xf32>
    %cst_11 = arith.constant 0.000000e+00 : f32
    %16 = vector.broadcast %cst_11 : f32 to vector<16x16xf32>
    %17 = arith.cmpf ogt, %1, %16 : vector<16x16xf32>
    %cst_12 = arith.constant -1.000000e+30 : f32
    %18 = vector.broadcast %cst_12 : f32 to vector<16x16xf32>
    %19 = arith.select %17, %15, %18 : vector<16x16xi1>, vector<16x16xf32>
    %cst_13 = arith.constant dense<0xFF800000> : vector<16xf32>
    %20 = vector.multi_reduction <maximumf>, %19, %cst_13 [1] : vector<16x16xf32> to vector<16xf32>
    %21 = vector.shape_cast %20 : vector<16xf32> to vector<16x1xf32>
    %22 = vector.broadcast %21 : vector<16x1xf32> to vector<16x16xf32>
    %23 = arith.subf %19, %22 : vector<16x16xf32>
    %24 = math.exp %23 : vector<16x16xf32>
    %cst_14 = arith.constant dense<0.000000e+00> : vector<16xf32>
    %25 = vector.multi_reduction <add>, %24, %cst_14 [1] : vector<16x16xf32> to vector<16xf32>
    %26 = vector.shape_cast %25 : vector<16xf32> to vector<16x1xf32>
    %27 = tpu.reciprocal %26 {approx = true} : vector<16x1xf32> -> vector<16x1xf32>
    %28 = vector.broadcast %27 : vector<16x1xf32> to vector<16x16xf32>
    %29 = arith.mulf %24, %28 : vector<16x16xf32>
    %cst_15 = arith.constant dense<0.000000e+00> : vector<16x128xf32>
    %30 = tpu.matmul %29, %5, %cst_15 {dimension_numbers = #tpu.dot_dimension_numbers<[1], [0], [0], [1], [0, 0, 1, 1], [], []>} : vector<16x16xf32>, vector<16x128xf32>, vector<16x128xf32> -> vector<16x128xf32>
    %31 = vector.broadcast %4 : vector<1x128xf32> to vector<16x128xf32>
    %32 = arith.addf %30, %31 : vector<16x128xf32>
    %cst_16 = arith.constant 0.000000e+00 : f32
    %33 = vector.broadcast %cst_16 : f32 to vector<16x128xf32>
    %34 = arith.cmpf ogt, %32, %33 : vector<16x128xf32>
    %cst_17 = arith.constant 0.000000e+00 : f32
    %35 = vector.broadcast %cst_17 : f32 to vector<16x128xf32>
    %36 = arith.minimumf %32, %35 : vector<16x128xf32>
    %37 = math.exp %36 : vector<16x128xf32>
    %cst_18 = arith.constant 1.000000e+00 : f32
    %38 = vector.broadcast %cst_18 : f32 to vector<16x128xf32>
    %39 = arith.subf %37, %38 : vector<16x128xf32>
    %40 = arith.select %34, %32, %39 : vector<16x128xi1>, vector<16x128xf32>
    %c0_19 = arith.constant 0 : index
    %c0_20 = arith.constant 0 : index
    %41 = vector.load %arg6[%c0_19, %c0_20] : memref<4x8xf32, #tpu.memory_space<vmem>>, vector<4x8xf32>
    %c0_21 = arith.constant 0 : index
    %c0_22 = arith.constant 0 : index
    %42 = vector.load %arg7[%c0_21, %c0_22] : memref<4x4xf32, #tpu.memory_space<vmem>>, vector<4x4xf32>
    %c0_23 = arith.constant 0 : index
    %c0_24 = arith.constant 0 : index
    %43 = vector.load %arg8[%c0_23, %c0_24] : memref<8x128xf32, #tpu.memory_space<vmem>>, vector<8x128xf32>
    %c0_25 = arith.constant 0 : index
    %c0_26 = arith.constant 0 : index
    %44 = vector.load %arg9[%c0_25, %c0_26] : memref<128x128xf32, #tpu.memory_space<vmem>>, vector<128x128xf32>
    %c0_27 = arith.constant 0 : index
    %c0_28 = arith.constant 0 : index
    %45 = vector.load %arg10[%c0_27, %c0_28] : memref<1x128xf32, #tpu.memory_space<vmem>>, vector<1x128xf32>
    %cst_29 = arith.constant dense<0.000000e+00> : vector<4x128xf32>
    %46 = tpu.matmul %41, %43, %cst_29 {dimension_numbers = #tpu.dot_dimension_numbers<[1], [0], [0], [1], [0, 0, 1, 1], [], []>} : vector<4x8xf32>, vector<8x128xf32>, vector<4x128xf32> -> vector<4x128xf32>
    %cst_30 = arith.constant dense<0.000000e+00> : vector<4x128xf32>
    %47 = tpu.matmul %46, %44, %cst_30 {dimension_numbers = #tpu.dot_dimension_numbers<[1], [0], [0], [1], [0, 0, 1, 1], [], []>} : vector<4x128xf32>, vector<128x128xf32>, vector<4x128xf32> -> vector<4x128xf32>
    %48 = vector.extract_strided_slice %47 {offsets = [0, 0], sizes = [4, 1], strides = [1, 1]} : vector<4x128xf32> to vector<4x1xf32>
    %49 = vector.extract_strided_slice %47 {offsets = [0, 1], sizes = [4, 1], strides = [1, 1]} : vector<4x128xf32> to vector<4x1xf32>
    %50 = tpu.transpose %48, [1, 0] : vector<4x1xf32> -> vector<1x4xf32>
    %51 = vector.broadcast %49 : vector<4x1xf32> to vector<4x4xf32>
    %52 = vector.broadcast %50 : vector<1x4xf32> to vector<4x4xf32>
    %53 = arith.addf %51, %52 : vector<4x4xf32>
    %cst_31 = arith.constant 2.000000e-01 : f32
    %54 = vector.broadcast %cst_31 : f32 to vector<4x4xf32>
    %55 = arith.mulf %54, %53 : vector<4x4xf32>
    %56 = arith.maximumf %53, %55 : vector<4x4xf32>
    %cst_32 = arith.constant 0.000000e+00 : f32
    %57 = vector.broadcast %cst_32 : f32 to vector<4x4xf32>
    %58 = arith.cmpf ogt, %42, %57 : vector<4x4xf32>
    %cst_33 = arith.constant -1.000000e+30 : f32
    %59 = vector.broadcast %cst_33 : f32 to vector<4x4xf32>
    %60 = arith.select %58, %56, %59 : vector<4x4xi1>, vector<4x4xf32>
    %cst_34 = arith.constant dense<0xFF800000> : vector<4xf32>
    %61 = vector.multi_reduction <maximumf>, %60, %cst_34 [1] : vector<4x4xf32> to vector<4xf32>
    %62 = vector.shape_cast %61 : vector<4xf32> to vector<4x1xf32>
    %63 = vector.broadcast %62 : vector<4x1xf32> to vector<4x4xf32>
    %64 = arith.subf %60, %63 : vector<4x4xf32>
    %65 = math.exp %64 : vector<4x4xf32>
    %cst_35 = arith.constant dense<0.000000e+00> : vector<4xf32>
    %66 = vector.multi_reduction <add>, %65, %cst_35 [1] : vector<4x4xf32> to vector<4xf32>
    %67 = vector.shape_cast %66 : vector<4xf32> to vector<4x1xf32>
    %68 = tpu.reciprocal %67 {approx = true} : vector<4x1xf32> -> vector<4x1xf32>
    %69 = vector.broadcast %68 : vector<4x1xf32> to vector<4x4xf32>
    %70 = arith.mulf %65, %69 : vector<4x4xf32>
    %cst_36 = arith.constant dense<0.000000e+00> : vector<4x128xf32>
    %71 = tpu.matmul %70, %46, %cst_36 {dimension_numbers = #tpu.dot_dimension_numbers<[1], [0], [0], [1], [0, 0, 1, 1], [], []>} : vector<4x4xf32>, vector<4x128xf32>, vector<4x128xf32> -> vector<4x128xf32>
    %72 = vector.broadcast %45 : vector<1x128xf32> to vector<4x128xf32>
    %73 = arith.addf %71, %72 : vector<4x128xf32>
    %cst_37 = arith.constant 0.000000e+00 : f32
    %74 = vector.broadcast %cst_37 : f32 to vector<4x128xf32>
    %75 = arith.cmpf ogt, %73, %74 : vector<4x128xf32>
    %cst_38 = arith.constant 0.000000e+00 : f32
    %76 = vector.broadcast %cst_38 : f32 to vector<4x128xf32>
    %77 = arith.minimumf %73, %76 : vector<4x128xf32>
    %78 = math.exp %77 : vector<4x128xf32>
    %cst_39 = arith.constant 1.000000e+00 : f32
    %79 = vector.broadcast %cst_39 : f32 to vector<4x128xf32>
    %80 = arith.subf %78, %79 : vector<4x128xf32>
    %81 = arith.select %75, %73, %80 : vector<4x128xi1>, vector<4x128xf32>
    %c0_40 = arith.constant 0 : index
    %c0_41 = arith.constant 0 : index
    %82 = vector.load %arg11[%c0_40, %c0_41] : memref<4x4xf32, #tpu.memory_space<vmem>>, vector<4x4xf32>
    %cst_42 = arith.constant dense<0.000000e+00> : vector<4xf32>
    %83 = vector.multi_reduction <add>, %82, %cst_42 [1] : vector<4x4xf32> to vector<4xf32>
    %84 = vector.shape_cast %83 : vector<4xf32> to vector<4x1xf32>
    %cst_43 = arith.constant 1.000000e+00 : f32
    %85 = vector.broadcast %cst_43 : f32 to vector<4x1xf32>
    %86 = arith.maximumf %84, %85 : vector<4x1xf32>
    %cst_44 = arith.constant dense<0.000000e+00> : vector<4x128xf32>
    %87 = tpu.matmul %82, %81, %cst_44 {dimension_numbers = #tpu.dot_dimension_numbers<[1], [0], [0], [1], [0, 0, 1, 1], [], []>} : vector<4x4xf32>, vector<4x128xf32>, vector<4x128xf32> -> vector<4x128xf32>
    %88 = tpu.reciprocal %86 {approx = true} : vector<4x1xf32> -> vector<4x1xf32>
    %89 = vector.broadcast %88 : vector<4x1xf32> to vector<4x128xf32>
    %90 = arith.mulf %87, %89 : vector<4x128xf32>
    %c0_45 = arith.constant 0 : index
    %c0_46 = arith.constant 0 : index
    %91 = vector.load %arg12[%c0_45, %c0_46] : memref<16x4xf32, #tpu.memory_space<vmem>>, vector<16x4xf32>
    %cst_47 = arith.constant dense<0.000000e+00> : vector<16x128xf32>
    %92 = tpu.matmul %91, %81, %cst_47 {dimension_numbers = #tpu.dot_dimension_numbers<[1], [0], [0], [1], [0, 0, 1, 1], [], []>} : vector<16x4xf32>, vector<4x128xf32>, vector<16x128xf32> -> vector<16x128xf32>
    %cst_48 = arith.constant dense<0.000000e+00> : vector<16x128xf32>
    %93 = tpu.matmul %91, %90, %cst_48 {dimension_numbers = #tpu.dot_dimension_numbers<[1], [0], [0], [1], [0, 0, 1, 1], [], []>} : vector<16x4xf32>, vector<4x128xf32>, vector<16x128xf32> -> vector<16x128xf32>
    %cst_49 = arith.constant dense<0.000000e+00> : vector<16xf32>
    %94 = vector.multi_reduction <add>, %91, %cst_49 [1] : vector<16x4xf32> to vector<16xf32>
    %95 = vector.shape_cast %94 : vector<16xf32> to vector<16x1xf32>
    %96 = arith.mulf %40, %92 : vector<16x128xf32>
    %cst_50 = arith.constant dense<0.000000e+00> : vector<16xf32>
    %97 = vector.multi_reduction <add>, %96, %cst_50 [1] : vector<16x128xf32> to vector<16xf32>
    %98 = vector.shape_cast %97 : vector<16xf32> to vector<16x1xf32>
    %99 = arith.mulf %40, %93 : vector<16x128xf32>
    %cst_51 = arith.constant dense<0.000000e+00> : vector<16xf32>
    %100 = vector.multi_reduction <add>, %99, %cst_51 [1] : vector<16x128xf32> to vector<16xf32>
    %101 = vector.shape_cast %100 : vector<16xf32> to vector<16x1xf32>
    %102 = vector.broadcast %98 : vector<16x1xf32> to vector<16x128xf32>
    %103 = arith.mulf %102, %92 : vector<16x128xf32>
    %104 = arith.addf %40, %103 : vector<16x128xf32>
    %105 = vector.broadcast %101 : vector<16x1xf32> to vector<16x128xf32>
    %106 = arith.mulf %105, %93 : vector<16x128xf32>
    %107 = arith.addf %104, %106 : vector<16x128xf32>
    %108 = vector.broadcast %95 : vector<16x1xf32> to vector<16x128xf32>
    %109 = arith.mulf %107, %108 : vector<16x128xf32>
    %c0_52 = arith.constant 0 : index
    %c0_53 = arith.constant 0 : index
    %110 = vector.load %arg16[%c0_52, %c0_53] : memref<16x128xf32, #tpu.memory_space<vmem>>, vector<16x128xf32>
    tpu.vector_store %arg16[%c0_52, %c0_53], %109 {strides = array<i32>} : memref<16x128xf32, #tpu.memory_space<vmem>>, vector<16x128xf32>,
    %c0_54 = arith.constant 0 : index
    %c0_55 = arith.constant 0 : index
    %111 = vector.load %arg13[%c0_54, %c0_55] : memref<128x128xf32, #tpu.memory_space<vmem>>, vector<128x128xf32>
    %cst_56 = arith.constant dense<0.000000e+00> : vector<16x128xf32>
    %112 = tpu.matmul %109, %111, %cst_56 {dimension_numbers = #tpu.dot_dimension_numbers<[1], [0], [0], [1], [0, 0, 1, 1], [], []>} : vector<16x128xf32>, vector<128x128xf32>, vector<16x128xf32> -> vector<16x128xf32>
    %c0_57 = arith.constant 0 : index
    %c0_58 = arith.constant 0 : index
    %113 = vector.load %arg14[%c0_57, %c0_58] : memref<1x128xf32, #tpu.memory_space<vmem>>, vector<1x128xf32>
    %114 = vector.broadcast %113 : vector<1x128xf32> to vector<16x128xf32>
    %115 = arith.addf %112, %114 : vector<16x128xf32>
    %c0_59 = arith.constant 0 : index
    %c0_60 = arith.constant 0 : index
    %116 = vector.load %arg15[%c0_59, %c0_60] : memref<16x128xf32, #tpu.memory_space<vmem>>, vector<16x128xf32>
    tpu.vector_store %arg15[%c0_59, %c0_60], %115 {strides = array<i32>} : memref<16x128xf32, #tpu.memory_space<vmem>>, vector<16x128xf32>,
    return
  }
  func.func @transform_0(%arg0: i32) -> (i32, i32) {
    %c0_i32 = arith.constant 0 : i32
    %c0_i32_0 = arith.constant 0 : i32
    %c0_i32_1 = arith.constant 0 : i32
    return %c0_i32, %c0_i32_0 : i32, i32
  }
  func.func @transform_1(%arg0: i32) -> (i32, i32) {
    %c0_i32 = arith.constant 0 : i32
    %c0_i32_0 = arith.constant 0 : i32
    %c0_i32_1 = arith.constant 0 : i32
    return %c0_i32, %c0_i32_0 : i32, i32
  }
  func.func @transform_2(%arg0: i32) -> (i32, i32) {
    %c0_i32 = arith.constant 0 : i32
    %c0_i32_0 = arith.constant 0 : i32
    %c0_i32_1 = arith.constant 0 : i32
    return %c0_i32, %c0_i32_0 : i32, i32
  }
  func.func @transform_3(%arg0: i32) -> (i32, i32) {
    %c0_i32 = arith.constant 0 : i32
    %c0_i32_0 = arith.constant 0 : i32
    %c0_i32_1 = arith.constant 0 : i32
    return %c0_i32, %c0_i32_0 : i32, i32
  }
  func.func @transform_4(%arg0: i32) -> (i32, i32) {
    %c0_i32 = arith.constant 0 : i32
    %c0_i32_0 = arith.constant 0 : i32
    %c0_i32_1 = arith.constant 0 : i32
    return %c0_i32, %c0_i32_0 : i32, i32
  }
  func.func @transform_5(%arg0: i32) -> (i32, i32) {
    %c0_i32 = arith.constant 0 : i32
    %c0_i32_0 = arith.constant 0 : i32
    %c0_i32_1 = arith.constant 0 : i32
    return %c0_i32, %c0_i32_0 : i32, i32
  }
  func.func @transform_6(%arg0: i32) -> (i32, i32) {
    %c0_i32 = arith.constant 0 : i32
    %c0_i32_0 = arith.constant 0 : i32
    %c0_i32_1 = arith.constant 0 : i32
    return %c0_i32, %c0_i32_0 : i32, i32
  }
  func.func @transform_7(%arg0: i32) -> (i32, i32) {
    %c0_i32 = arith.constant 0 : i32
    %c0_i32_0 = arith.constant 0 : i32
    %c0_i32_1 = arith.constant 0 : i32
    return %c0_i32, %c0_i32_0 : i32, i32
  }
  func.func @transform_8(%arg0: i32) -> (i32, i32) {
    %c0_i32 = arith.constant 0 : i32
    %c0_i32_0 = arith.constant 0 : i32
    %c0_i32_1 = arith.constant 0 : i32
    return %c0_i32, %c0_i32_0 : i32, i32
  }
  func.func @transform_9(%arg0: i32) -> (i32, i32) {
    %c0_i32 = arith.constant 0 : i32
    %c0_i32_0 = arith.constant 0 : i32
    %c0_i32_1 = arith.constant 0 : i32
    return %c0_i32, %c0_i32_0 : i32, i32
  }
  func.func @transform_10(%arg0: i32) -> (i32, i32) {
    %c0_i32 = arith.constant 0 : i32
    %c0_i32_0 = arith.constant 0 : i32
    %c0_i32_1 = arith.constant 0 : i32
    return %c0_i32, %c0_i32_0 : i32, i32
  }
  func.func @transform_11(%arg0: i32) -> (i32, i32) {
    %c0_i32 = arith.constant 0 : i32
    %c0_i32_0 = arith.constant 0 : i32
    %c0_i32_1 = arith.constant 0 : i32
    return %c0_i32, %c0_i32_0 : i32, i32
  }
  func.func @transform_12(%arg0: i32) -> (i32, i32) {
    %c0_i32 = arith.constant 0 : i32
    %c0_i32_0 = arith.constant 0 : i32
    %c0_i32_1 = arith.constant 0 : i32
    return %c0_i32, %c0_i32_0 : i32, i32
  }
  func.func @transform_13(%arg0: i32) -> (i32, i32) {
    %c0_i32 = arith.constant 0 : i32
    %c0_i32_0 = arith.constant 0 : i32
    %c0_i32_1 = arith.constant 0 : i32
    return %c0_i32, %c0_i32_0 : i32, i32
  }
  func.func @transform_14(%arg0: i32) -> (i32, i32) {
    %c0_i32 = arith.constant 0 : i32
    %c0_i32_0 = arith.constant 0 : i32
    %c0_i32_1 = arith.constant 0 : i32
    return %c0_i32, %c0_i32_0 : i32, i32
  }
  func.func @transform_15(%arg0: i32) -> (i32, i32) {
    %c0_i32 = arith.constant 0 : i32
    %c0_i32_0 = arith.constant 0 : i32
    %c0_i32_1 = arith.constant 0 : i32
    return %c0_i32, %c0_i32_0 : i32, i32
  }
}

</mosaic_0001>

<bundles_post_ra>
// kernel: forward.1
= control target key start
LH: loop header
LB: loop body
LE: loop exit
PB: predicated region body
PF: predicated region fallthrough
CT: control target
= control target key end

     0   :  { %21 = vsyncpa [#allocation3], 0  ;;  %s1885_s0 = inlined_call_operand.vmem [shape: f32[16,8], index: 0, kind: input, shape index: {}]   ;;  %s1886_s1 = inlined_call_operand.vmem [shape: f32[16,16], index: 1, kind: input, shape index: {}]   ;;  %s1887_s2 = inlined_call_operand.vmem [shape: f32[8,128], index: 2, kind: input, shape index: {}]   ;;  %s1888_s3 = inlined_call_operand.hbm [shape: f32[128,128], index: 3, kind: input, shape index: {}]   ;;  %s1889_s4 = inlined_call_operand.vmem [shape: f32[1,128], index: 4, kind: input, shape index: {}]   ;;  %s1890_s5 = inlined_call_operand.vmem [shape: f32[4,8], index: 5, kind: input, shape index: {}]   ;;  %s1891_s6 = inlined_call_operand.vmem [shape: f32[4,4], index: 6, kind: input, shape index: {}]   ;;  %s1892_s7 = inlined_call_operand.vmem [shape: f32[8,128], index: 7, kind: input, shape index: {}]   ;;  %s1893_s8 = inlined_call_operand.hbm [shape: f32[128,128], index: 8, kind: input, shape index: {}]   ;;  %s1894_s9 = inlined_call_operand.vmem [shape: f32[1,128], index: 9, kind: input, shape index: {}]   ;;  %s1895_s10 = inlined_call_operand.vmem [shape: f32[4,4], index: 10, kind: input, shape index: {}]   ;;  %s1896_s11 = inlined_call_operand.vmem [shape: f32[16,4], index: 11, kind: input, shape index: {}]   ;;  %s1897_s12 = inlined_call_operand.hbm [shape: f32[128,128], index: 12, kind: input, shape index: {}]   ;;  %s1898_s13 = inlined_call_operand.vmem [shape: f32[1,128], index: 13, kind: input, shape index: {}]   ;;  %s1899_s14 = inlined_call_operand.vmem [shape: f32[16,128], index: 14, kind: output, shape index: {0}]   ;;  %s1900_s15 = inlined_call_operand.hbm [shape: f32[16,128], index: 15, kind: output, shape index: {1}]  }
   0x1   :  { %22 = vsyncpa [#allocation6], 0 }
   0x2   :  { %23 = vsyncpa [#allocation4], 0  ;;  %s1607_s18 = smov [#allocation5]   ;;  %s1608_s20 = smov [#allocation2]  }
   0x3   :  { %s55_s19 = sshll.u32 %s1607_s18, 4  ;;  %s35_s21 = sshll.u32 %s1608_s20, 4  ;;  %s56_s19 = int_to_ptr.vmem [resolvable:$true] %s55_s19  ;;  %s1697_s21 = int_to_ptr.vmem [resolvable:$true] %s35_s21 }
   0x4   :  { %s1513_s24 = scalar_lea.hbm %s1893_s8, 2048 }
   0x5   :  { %p1514_p0 = scmp.ne.s32.totalorder %s1893_s8, %s1513_s24  ;;  %p1517_p1 = scmp.lt.u32.totalorder %s1513_s24, %s1893_s8 }
   0x7   :  { %p1519_p2 = pnand %p1517_p1, %p1514_p0 }
   0x9   :  { %1522 = shalt.err (!%p1519_p2)
}
   0xa   :  { %s1523_s29 = scalar_lea.vmem %s56_s19, 2048  ;;  %p1528_p4 = scmp.lt.s32.totalorder %s56_s19, %s56_s19 }
   0xb   :  { %p1524_p3 = scmp.ne.s32.totalorder %s56_s19, %s1523_s29  ;;  %p1529_p5 = scmp.lt.s32.totalorder %s1523_s29, %s1523_s29 }
   0xd   :  { %p1530_p6 = por %p1529_p5, %p1528_p4 }
   0xf   :  { %p1531_p7 = pnand %p1530_p6, %p1524_p3 }
  0x11   :  { %1534 = shalt.err (!%p1531_p7)
}
  0x12   :  { %s1609_s30 = smov 128   ;;  %s1610_s16 = smov 8  }
  0x13   :  { %61 = dma.hbm_to_vmem [thread:$0]  %s1893_s8, 2048, %s56_s19, [#allocation6], %s1609_s30, %s1609_s30, %s1610_s16  }
  0x14   :  { %s1535_s23 = scalar_lea.hbm %s1888_s3, 2048 }
  0x15   :  { %p1536_p8 = scmp.ne.s32.totalorder %s1888_s3, %s1535_s23  ;;  %p1539_p9 = scmp.lt.u32.totalorder %s1535_s23, %s1888_s3 }
  0x17   :  { %p1541_p10 = pnand %p1539_p9, %p1536_p8 }
  0x19   :  { %1544 = shalt.err (!%p1541_p10)
}
  0x1a   :  { %s1545_s28 = scalar_lea.vmem %s1697_s21, 2048  ;;  %p1550_p12 = scmp.lt.s32.totalorder %s1697_s21, %s1697_s21 }
  0x1b   :  { %p1546_p11 = scmp.ne.s32.totalorder %s1697_s21, %s1545_s28  ;;  %p1551_p13 = scmp.lt.s32.totalorder %s1545_s28, %s1545_s28 }
  0x1d   :  { %p1552_p0 = por %p1551_p13, %p1550_p12 }
  0x1f   :  { %p1553_p1 = pnand %p1552_p0, %p1546_p11 }
  0x21   :  { %1556 = shalt.err (!%p1553_p1)
}
  0x22   :  { %41 = dma.hbm_to_vmem [thread:$0]  %s1888_s3, 2048, %s1697_s21, [#allocation3], %s1609_s30, %s1609_s30, %s1610_s16  }
  0x23   :  { %s1611_s29 = smov [#allocation7]   ;;  %s1557_s22 = scalar_lea.hbm %s1897_s12, 2048 }
  0x24   :  { %s73_s17 = sshll.u32 %s1611_s29, 4  ;;  %p1558_p2 = scmp.ne.s32.totalorder %s1897_s12, %s1557_s22  ;;  %s74_s17 = int_to_ptr.vmem [resolvable:$true] %s73_s17 }
  0x25   :  { %p1561_p3 = scmp.lt.u32.totalorder %s1557_s22, %s1897_s12 }
  0x27   :  { %p1563_p4 = pnand %p1561_p3, %p1558_p2 }
  0x29   :  { %1566 = shalt.err (!%p1563_p4)
}
  0x2a   :  { %s1567_s27 = scalar_lea.vmem %s74_s17, 2048  ;;  %p1572_p6 = scmp.lt.s32.totalorder %s74_s17, %s74_s17 }
  0x2b   :  { %p1568_p5 = scmp.ne.s32.totalorder %s74_s17, %s1567_s27  ;;  %p1573_p7 = scmp.lt.s32.totalorder %s1567_s27, %s1567_s27 }
  0x2d   :  { %p1574_p8 = por %p1573_p7, %p1572_p6 }
  0x2f   :  { %p1575_p9 = pnand %p1574_p8, %p1568_p5 }
  0x31   :  { %1578 = shalt.err (!%p1575_p9)
}
  0x32   :  { %79 = dma.hbm_to_vmem [thread:$0]  %s1897_s12, 2048, %s74_s17, [#allocation6], %s1609_s30, %s1609_s30, %s1610_s16  }
  0x33   :  { %1601 = dma.done.wait [#allocation3], 2048  }
  0x34   :  { %1602 = vsyncadd [#allocation3], 4294965248 }
  0x35   :  { %1603 = dma.done.wait [#allocation6], 4096  }
  0x36   :  { %1604 = vsyncadd [#allocation6], 4294963200  ;;  %vm113_vm0 = vcmask 64512   ;;  %v95_v0 = vld [vmem:[%s1887_s2] sm:$0xff]  ;;  %v92_v2 = vld [vmem:[%s1885_s0 + $0x8] sm:$0xff]  ;;  %v1612_v30 = vmov 1   ;;  %v312_v33 = vlaneseq }
  0x37   :  { %v91_v1 = vld [vmem:[%s1885_s0] sm:$0xff]  ;;  %1248 = vmatprep.subr.mxu0 %v95_v0  ;;  %v97_v4 = vld [vmem:[#allocation2 + $0x8] sm:$0xff]  ;;  %v98_v5 = vld [vmem:[#allocation2 + $0x10] sm:$0xff]  ;;  %1492 = vset.pattern.permute.xlu0 %v1612_v30  ;;  %vm326_vm2 = vcmask 130048   ;;  %v1613_v62 = vmov 0.0   ;;  %vm1614_vm4 = vmmov 0  }
  0x38   :  { %1250 = vmatprep.mubr.msk.f32.mxu0 %vm113_vm0, %v91_v1  ;;  %v96_v3 = vld [vmem:[#allocation2] sm:$0xff]  ;;  %1249 = vmatpush3.msra.mxu0 %v95_v0  ;;  %v99_v7 = vld [vmem:[#allocation2 + $0x18] sm:$0xff]  ;;  %v101_v10 = vld [vmem:[#allocation2 + $0x28] sm:$0xff]  ;;  %v1760_v34 = vshrl.u32 %v312_v33, 7  ;;  %vm679_vm5 = vcmask 1043456   ;;  %vm657_vm7 = vcmask 27648  }
  0x39   :  { %v1390_v6 = vpack.c.bf16 %v97_v4, %v96_v3  ;;  %1251 = vmatmul.mubr.msk.f32.vlgmr.msra.gmra.mrb[0].mxu0 %vm113_vm0, %v92_v2  ;;  %v1394_v8 = vpack.c.bf16 %v99_v7, %v98_v5  ;;  %v100_v9 = vld [vmem:[#allocation2 + $0x20] sm:$0xff]  ;;  %v102_v12 = vld [vmem:[#allocation2 + $0x30] sm:$0xff]  ;;  %v103_v13 = vld [vmem:[#allocation2 + $0x38] sm:$0xff]  ;;  %vm675_vm8 = vcmask 31744  }
  0x3a   :  { %v1398_v11 = vpack.c.bf16 %v101_v10, %v100_v9  ;;  %v1402_v14 = vpack.c.bf16 %v103_v13, %v102_v12  ;;  %v104_v15 = vld [vmem:[#allocation2 + $0x40] sm:$0xff]  ;;  %v105_v16 = vld [vmem:[#allocation2 + $0x48] sm:$0xff]  ;;  %v106_v18 = vld [vmem:[#allocation2 + $0x50] sm:$0xff]  ;;  %v314_v35 = vsub.s32 0, %v1760_v34  ;;  %v1615_v10 = vmov 0.0|0.0  }
  0x3b   :  { %1391 = vmatprep.subr.bf16.mxu1 %v1390_v6  ;;  %v1406_v17 = vpack.c.bf16 %v105_v16, %v104_v15  ;;  %v107_v19 = vld [vmem:[#allocation2 + $0x58] sm:$0xff]  ;;  %v108_v21 = vld [vmem:[#allocation2 + $0x60] sm:$0xff]  ;;  %v109_v22 = vld [vmem:[#allocation2 + $0x68] sm:$0xff] }
  0x3c   :  { %1393 = vmatpush3.bf16.msra.mxu1 %v1390_v6  ;;  %v1410_v20 = vpack.c.bf16 %v107_v19, %v106_v18  ;;  %v1414_v23 = vpack.c.bf16 %v109_v22, %v108_v21  ;;  %v110_v24 = vld [vmem:[#allocation2 + $0x70] sm:$0xff]  ;;  %v111_v25 = vld [vmem:[#allocation2 + $0x78] sm:$0xff]  ;;  %v93_v41 = vld [vmem:[%s1886_s1] sm:$0xff] }
  0x3d   :  { %1395 = vmatprep.subr.bf16.mxu1 %v1394_v8  ;;  %v1418_v26 = vpack.c.bf16 %v111_v25, %v110_v24  ;;  %v94_v43 = vld [vmem:[%s1886_s1 + $0x8] sm:$0xff]  ;;  %vm322_vm1 = vcmp.gt.f32.partialorder %v93_v41, 0.0  ;;  %v450_v5 = vld [vmem:[%s1892_s7] sm:$0xff]  ;;  %v454_v12 = vld [vmem:[#allocation5 + $0x18] sm:$0xff] }
  0x3e   :  { %vm323_vm3 = vcmp.gt.f32.partialorder %v94_v43, 0.0  ;;  %v451_v6 = vld [vmem:[#allocation5] sm:$0xff]  ;;  %v452_v7 = vld [vmem:[#allocation5 + $0x8] sm:$0xff]  ;;  %v458_v18 = vld [vmem:[#allocation5 + $0x38] sm:$0xff] }
  0x3f   :  { %v1427_v9 = vpack.c.bf16 %v452_v7, %v451_v6  ;;  %v456_v15 = vld [vmem:[#allocation5 + $0x28] sm:$0xff]  ;;  %v462_v24 = vld [vmem:[#allocation5 + $0x58] sm:$0xff] }
  0x40   :  { %1397 = vmatpush3.bf16.msra.mxu1 %v1394_v8  ;;  %v448_v8 = vld [vmem:[%s1890_s5] sm:$0xf]  ;;  %v460_v21 = vld [vmem:[#allocation5 + $0x48] sm:$0xff]  ;;  %v466_v30 = vld [vmem:[#allocation5 + $0x78] sm:$0xff] }
  0x41   :  { %1399 = vmatprep.subr.bf16.mxu1 %v1398_v11 }
  0x44   :  { %1401 = vmatpush3.bf16.msra.mxu1 %v1398_v11  ;;  %v453_v11 = vld [vmem:[#allocation5 + $0x10] sm:$0xff] }
  0x45   :  { %1403 = vmatprep.subr.bf16.mxu1 %v1402_v14  ;;  %v1430_v13 = vpack.c.bf16 %v454_v12, %v453_v11 }
  0x48   :  { %1405 = vmatpush3.bf16.msra.mxu1 %v1402_v14  ;;  %v455_v14 = vld [vmem:[#allocation5 + $0x20] sm:$0xff] }
  0x49   :  { %1407 = vmatprep.subr.bf16.mxu1 %v1406_v17  ;;  %v1433_v16 = vpack.c.bf16 %v456_v15, %v455_v14 }
  0x4c   :  { %1409 = vmatpush3.bf16.msra.mxu1 %v1406_v17  ;;  %v457_v17 = vld [vmem:[#allocation5 + $0x30] sm:$0xff] }
  0x4d   :  { %1411 = vmatprep.subr.bf16.mxu1 %v1410_v20  ;;  %v1436_v19 = vpack.c.bf16 %v458_v18, %v457_v17 }
  0x50   :  { %1413 = vmatpush3.bf16.msra.mxu1 %v1410_v20  ;;  %v459_v20 = vld [vmem:[#allocation5 + $0x40] sm:$0xff] }
  0x51   :  { %1415 = vmatprep.subr.bf16.mxu1 %v1414_v23  ;;  %v1439_v22 = vpack.c.bf16 %v460_v21, %v459_v20 }
  0x54   :  { %1417 = vmatpush3.bf16.msra.mxu1 %v1414_v23  ;;  %v461_v23 = vld [vmem:[#allocation5 + $0x50] sm:$0xff] }
  0x55   :  { %1419 = vmatprep.subr.bf16.mxu1 %v1418_v26  ;;  %v1442_v25 = vpack.c.bf16 %v462_v24, %v461_v23 }
  0x58   :  { %1421 = vmatpush3.bf16.msra.mxu1 %v1418_v26  ;;  %v463_v26 = vld [vmem:[#allocation5 + $0x60] sm:$0xff] }
 0x10c   :  { %v1252_v27 = vpop.f32.mrb[0].mxu0 }
 0x10d   :  { %v186_v28 = vpop.f32.mrb[1].mxu0 }
 0x10e   :  { %v1422_v29 = vpack.c.bf16 %v1252_v27, %v186_v28  ;;  %1285 = vmatprep.mubr.f32.mxu1 %v186_v28 }
 0x10f   :  { %1286 = vmatmul.mubr.f32.vlgmr.msra.gmra.mrb[0].mxu1 %v1252_v27  ;;  %v464_v27 = vld [vmem:[#allocation5 + $0x68] sm:$0xff] }
 0x110   :  { %1423 = vmatprep.subr.bf16.mxu0 %v1422_v29  ;;  %v1445_v28 = vpack.c.bf16 %v464_v27, %v463_v26  ;;  %v1033_v27 = vld [vmem:[#allocation7] sm:$0xff] }
 0x111   :  { %1425 = vmatpush3.bf16.msra.mxu0 %v1422_v29  ;;  %v465_v29 = vld [vmem:[#allocation5 + $0x70] sm:$0xff] }
 0x112   :  { %1295 = vmatprep.subr.mxu0 %v1613_v62 }
 0x1e2   :  { %v1287_v31 = vpop.f32.mrb[0].mxu1 }
 0x1e3   :  { %v261_v32 = vpop.f32.mrb[1].mxu1 }
 0x1e4   :  { %270 = vxpose.xlu1.b32.start [1/2] (short) (narrow) %v261_v32, 8  ;;  %304 = vperm.xlu0 %1492, %v261_v32  }
 0x1e8   :  { %271 = vxpose.xlu1.b32.end [2/2] (short) (narrow) %v1287_v31, 8  ;;  %309 = vperm.xlu0 %1492, %v1287_v31   ;;  %v1448_v31 = vpack.c.bf16 %v466_v30, %v465_v29  ;;  %v1035_v29 = vld [vmem:[#allocation7 + $0x10] sm:$0xff] }
 0x263   :  { %v305_v36 = vpop.permute.xlu0 %304 }
 0x264   :  { %v286_v37 = vpop.trf.xlu1 }
 0x265   :  { %v315_v38 = vrot.slane %v286_v37, %v314_v35 }
 0x267   :  { %v316_v39 = vadd.f32 %v315_v38, %v305_v36  ;;  %v310_v40 = vpop.permute.xlu0 %309 }
 0x268   :  { %v317_v42 = vadd.f32 %v315_v38, %v310_v40 }
 0x269   :  { %v318_v44 = vmul.f32 0.2, %v316_v39 }
 0x26a   :  { %v319_v45 = vmul.f32 0.2, %v317_v42 }
 0x26b   :  { %v320_v46 = vmax.f32 %v316_v39, %v318_v44  ;;  %v449_v44 = vld [vmem:[%s1891_s6] sm:$0xf] }
 0x26c   :  { %v321_v47 = vmax.f32 %v317_v42, %v319_v45  ;;  %vm655_vm6 = vcmp.gt.f32.partialorder %v449_v44, 0.0 }
 0x26d   :  { %v324_v48 = vsel %vm322_vm1, %v320_v46, -1e+30 }
 0x26e   :  { %v327_v49 = vsel %vm326_vm2, %v324_v48, -inf  ;;  %v325_v50 = vsel %vm323_vm3, %v321_v47, -1e+30 }
 0x26f   :  { %328 = vmax.xlane.f32.xlu0 %v327_v49  ;;  %v330_v51 = vsel %vm326_vm2, %v325_v50, -inf }
 0x270   :  { %331 = vmax.xlane.f32.xlu1 %v330_v51 }
 0x2fc   :  { %v329_v52 = vpop.xlane.xlu0 %328 }
 0x2fd   :  { %v333_v53 = vsub.f32 %v324_v48, %v329_v52  ;;  %v332_v54 = vpop.xlane.xlu1 %331 }
 0x2fe   :  { %v334_v55 = vsub.f32 %v325_v50, %v332_v54 }
 0x2ff   :  { %v335_v56 = vmul.f32 1.442695, %v333_v53 }
 0x300   :  { %v337_v57 = vmul.f32 1.442695, %v334_v55  ;;  %v759_v55 = vld [vmem:[%s1895_s10] sm:$0xf] }
 0x301   :  { %1493 = vpow2.f32 %v335_v56  ;;  %v760_v56 = vsel %vm657_vm7, %v759_v55, 0.0 }
 0x302   :  { %1495 = vpow2.f32 %v337_v57  ;;  %v1163_v57 = vld [vmem:[%s1894_s9] ss:$0 sm:$0xff] }
 0x30b   :  { %v1494_v58 = vpop.eup %1493 }
 0x30c   :  { %v339_v59 = vsel %vm326_vm2, %v1494_v58, 0.0  ;;  %v1496_v60 = vpop.eup %1495 }
 0x30d   :  { %340 = vadd.xlane.f32.xlu0 %v339_v59  ;;  %v342_v61 = vsel %vm326_vm2, %v1496_v60, 0.0 }
 0x311   :  { %343 = vadd.xlane.f32.xlu0 %v342_v61 }
 0x39a   :  { %v341_v63 = vpop.xlane.xlu0 %340 }
 0x39b   :  { %1497 = vrcp.f32 %v341_v63 }
 0x39e   :  { %v344_v0 = vpop.xlane.xlu0 %343 }
 0x39f   :  { %1499 = vrcp.f32 %v344_v0 }
 0x3a5   :  { %v1498_v1 = vpop.eup %1497 }
 0x3a6   :  { %v347_v2 = vmul.f32 %v1498_v1, %v1494_v58 }
 0x3a8   :  { %1292 = vmatprep.mubr.msk.f32.mxu0 %vm326_vm2, %v347_v2  ;;  %v1818_v2 = vld [vmem:[%s1896_s11] sm:$0xff] }
 0x3a9   :  { %v1500_v3 = vpop.eup %1499 }
 0x3aa   :  { %v348_v4 = vmul.f32 %v1500_v3, %v1496_v60  ;;  %v1829_v3 = vld [vmem:[%s1896_s11 + $0x8] sm:$0xff] }
 0x3ac   :  { %1293 = vmatmul.mubr.msk.f32.vlgmr.msra.gmra.mrb[2].mxu0 %vm326_vm2, %v348_v4  ;;  %v1157_v4 = vld [vmem:[%s1889_s4] ss:$0 sm:$0xff]  ;;  %s1616_s4 = smov [#allocation8]  }
 0x3ad   :  { %1296 = vmatpush3.msra.mxu0 %v450_v5  ;;  %1297 = vmatprep.mubr.msk.f32.mxu0 %vm1614_vm4, %v1613_v62  ;;  %s1140_s11 = sshll.u32 %s1616_s4, 4  ;;  %s1141_s11 = int_to_ptr.vmem [resolvable:$true] %s1140_s11 }
 0x3ae   :  { %1426 = vmatprep.subr.bf16.mxu0 %v1615_v10  ;;  %s1579_s19 = scalar_lea.vmem %s1141_s11, 256  ;;  %p1584_p11 = scmp.lt.s32.totalorder %s1141_s11, %s1141_s11 }
 0x3af   :  { %p1580_p10 = scmp.ne.s32.totalorder %s1141_s11, %s1579_s19  ;;  %p1585_p12 = scmp.lt.s32.totalorder %s1579_s19, %s1579_s19 }
 0x3b0   :  { %1298 = vmatmul.mubr.msk.f32.vlgmr.msra.gmra.mrb[4].mxu0 %vm113_vm0, %v448_v8 }
 0x3b1   :  { %1428 = vmatpush3.bf16.msra.mxu0 %v1427_v9  ;;  %1332 = vmatprep.mubr.msk.f32.mxu0 %vm1614_vm4, %v1613_v62  ;;  %p1586_p13 = por %p1585_p12, %p1584_p11 }
 0x3b2   :  { %1429 = vmatprep.subr.bf16.mxu0 %v1615_v10 }
 0x3b3   :  { %p1587_p0 = pnand %p1586_p13, %p1580_p10 }
 0x3b5   :  { %1431 = vmatpush3.bf16.msra.mxu0 %v1430_v13 }
 0x3b6   :  { %1432 = vmatprep.subr.bf16.mxu0 %v1615_v10 }
 0x3b9   :  { %1434 = vmatpush3.bf16.msra.mxu0 %v1433_v16 }
 0x3ba   :  { %1435 = vmatprep.subr.bf16.mxu0 %v1615_v10 }
 0x3bd   :  { %1437 = vmatpush3.bf16.msra.mxu0 %v1436_v19 }
 0x3be   :  { %1438 = vmatprep.subr.bf16.mxu0 %v1615_v10 }
 0x3c1   :  { %1440 = vmatpush3.bf16.msra.mxu0 %v1439_v22 }
 0x3c2   :  { %1441 = vmatprep.subr.bf16.mxu0 %v1615_v10 }
 0x3c5   :  { %1443 = vmatpush3.bf16.msra.mxu0 %v1442_v25 }
 0x3c6   :  { %1444 = vmatprep.subr.bf16.mxu0 %v1615_v10 }
 0x3c9   :  { %1446 = vmatpush3.bf16.msra.mxu0 %v1445_v28  ;;  %v1034_v28 = vld [vmem:[#allocation7 + $0x8] sm:$0xff] }
 0x3ca   :  { %1447 = vmatprep.subr.bf16.mxu0 %v1615_v10  ;;  %v1450_v30 = vpack.c.bf16 %v1034_v28, %v1033_v27 }
 0x3cc   :  { %1451 = vmatprep.subr.bf16.mxu1 %v1450_v30 }
 0x3cd   :  { %1449 = vmatpush3.bf16.msra.mxu0 %v1448_v31  ;;  %v1036_v31 = vld [vmem:[#allocation7 + $0x18] sm:$0xff]  ;;  %1453 = vmatpush3.bf16.msra.mxu1 %v1450_v30 }
 0x3ce   :  { %1335 = vmatprep.subr.mxu0 %v1613_v62 }
 0x47f   :  { %v1790_v32 = vpop.f32.mrb[2].mxu0 }
 0x480   :  { %v1792_v33 = vpop.f32.mrb[3].mxu0  ;;  %v433_v5 = vadd.f32 %v1790_v32, %v1157_v4  ;;  %v1454_v32 = vpack.c.bf16 %v1036_v31, %v1035_v29 }
 0x481   :  { %v428_v7 = vadd.f32 %v1157_v4, %v1792_v33  ;;  %v1037_v33 = vld [vmem:[#allocation7 + $0x20] sm:$0xff] }
 0x482   :  { %v439_v6 = vmin.f32 %v433_v5, 0.0  ;;  %vm437_vm10 = vcmp.gt.f32.partialorder %v433_v5, 0.0  ;;  %1455 = vmatprep.subr.bf16.mxu1 %v1454_v32 }
 0x483   :  { %v537_v36 = vpop.f32.mrb[4].mxu0  ;;  %v438_v10 = vmin.f32 %v428_v7, 0.0  ;;  %vm436_vm11 = vcmp.gt.f32.partialorder %v428_v7, 0.0  ;;  %1457 = vmatpush3.bf16.msra.mxu1 %v1454_v32 }
 0x484   :  { %v1299_v37 = vpop.f32.mrb[5].mxu0  ;;  %1333 = vmatmul.mubr.f32.vlgmr.msra.gmra.mrb[6].mxu0 %v537_v36  ;;  %v442_v9 = vmul.f32 1.442695, %v439_v6 }
 0x485   :  { %1336 = vmatpush3.msk.msra.mxu0 %vm679_vm5, %v537_v36  ;;  %1337 = vmatprep.mubr.msk.f32.mxu0 %vm1614_vm4, %v1613_v62  ;;  %v440_v12 = vmul.f32 1.442695, %v438_v10  ;;  %v1038_v36 = vld [vmem:[#allocation7 + $0x28] sm:$0xff] }
 0x486   :  { %1340 = vmatprep.subr.mxu0 %v1613_v62  ;;  %v1458_v37 = vpack.c.bf16 %v1038_v36, %v1037_v33 }
 0x488   :  { %1459 = vmatprep.subr.bf16.mxu1 %v1458_v37 }
 0x489   :  { %1461 = vmatpush3.bf16.msra.mxu1 %v1458_v37 }
 0x557   :  { %v607_v38 = vpop.f32.mrb[6].mxu0 }
 0x558   :  { %611 = vxpose.xlu1.b32.start.end [1/1] (short) (narrow) %v607_v38, 8  ;;  %645 = vperm.xlu0 %1492, %v607_v38   ;;  %v1334_v39 = vpop.f32.mrb[7].mxu0  ;;  %v1039_v38 = vld [vmem:[#allocation7 + $0x30] sm:$0xff] }
 0x559   :  { %v1040_v39 = vld [vmem:[#allocation7 + $0x38] sm:$0xff] }
 0x5d7   :  { %v646_v42 = vpop.permute.xlu0 %645 }
 0x5d8   :  { %v627_v40 = vpop.trf.xlu1 }
 0x5d9   :  { %v651_v41 = vrot.slane %v627_v40, %v314_v35  ;;  %v1462_v40 = vpack.c.bf16 %v1040_v39, %v1039_v38 }
 0x5db   :  { %v652_v43 = vadd.f32 %v651_v41, %v646_v42  ;;  %v1041_v41 = vld [vmem:[#allocation7 + $0x40] sm:$0xff]  ;;  %v1042_v42 = vld [vmem:[#allocation7 + $0x48] sm:$0xff]  ;;  %1463 = vmatprep.subr.bf16.mxu1 %v1462_v40 }
 0x5dc   :  { %1465 = vmatpush3.bf16.msra.mxu1 %v1462_v40 }
 0x5dd   :  { %v653_v45 = vmul.f32 0.2, %v652_v43 }
 0x5df   :  { %v654_v46 = vmax.f32 %v652_v43, %v653_v45  ;;  %v1466_v43 = vpack.c.bf16 %v1042_v42, %v1041_v41 }
 0x5e1   :  { %v656_v47 = vsel %vm655_vm6, %v654_v46, -1e+30  ;;  %1467 = vmatprep.subr.bf16.mxu1 %v1466_v43 }
 0x5e2   :  { %v658_v48 = vsel %vm657_vm7, %v656_v47, -inf  ;;  %1469 = vmatpush3.bf16.msra.mxu1 %v1466_v43 }
 0x5e3   :  { %659 = vmax.xlane.f32.xlu0 %v658_v48  ;;  %v1003_v48 = vsel %vm675_vm8, %v1818_v2, 0.0 }
 0x5e7   :  { %761 = vadd.xlane.f32.xlu0 %v760_v56 }
 0x670   :  { %v660_v49 = vpop.xlane.xlu0 %659 }
 0x671   :  { %v661_v50 = vsub.f32 %v656_v47, %v660_v49  ;;  %v1006_v49 = vsel %vm675_vm8, %v1829_v3, 0.0 }
 0x673   :  { %v662_v51 = vmul.f32 1.442695, %v661_v50  ;;  %v1043_v50 = vld [vmem:[#allocation7 + $0x50] sm:$0xff] }
 0x674   :  { %v762_v8 = vpop.xlane.xlu0 %761 }
 0x675   :  { %1501 = vpow2.f32 %v662_v51  ;;  %v763_v11 = vmax.f32 %v762_v8, 1.0  ;;  %v1044_v51 = vld [vmem:[#allocation7 + $0x58] sm:$0xff] }
 0x67f   :  { %v1502_v34 = vpop.eup %1501 }
 0x680   :  { %v664_v35 = vsel %vm657_vm7, %v1502_v34, 0.0 }
 0x681   :  { %665 = vadd.xlane.f32.xlu1 %v664_v35  ;;  %v1045_v35 = vld [vmem:[#allocation7 + $0x60] sm:$0xff] }
 0x70e   :  { %v666_v52 = vpop.xlane.xlu1 %665 }
 0x70f   :  { %1503 = vrcp.f32 %v666_v52  ;;  %v1046_v52 = vld [vmem:[#allocation7 + $0x68] sm:$0xff] }
 0x719   :  { %v1504_v53 = vpop.eup %1503 }
 0x71a   :  { %v668_v54 = vmul.f32 %v1504_v53, %v1502_v34  ;;  %v1470_v34 = vpack.c.bf16 %v1044_v51, %v1043_v50  ;;  %v1474_v53 = vpack.c.bf16 %v1046_v52, %v1045_v35 }
 0x71c   :  { %1338 = vmatmul.mubr.msk.f32.vlgmr.msra.gmra.mrb[8].mxu0 %vm675_vm8, %v668_v54  ;;  %1471 = vmatprep.subr.bf16.mxu1 %v1470_v34  ;;  %v1047_v54 = vld [vmem:[#allocation7 + $0x70] sm:$0xff] }
 0x71d   :  { %1342 = vmatprep.mubr.msk.f32.mxu0 %vm1614_vm4, %v1613_v62  ;;  %1473 = vmatpush3.bf16.msra.mxu1 %v1470_v34 }
 0x71e   :  { %1475 = vmatprep.subr.bf16.mxu1 %v1474_v53 }
 0x721   :  { %1477 = vmatpush3.bf16.msra.mxu1 %v1474_v53 }
 0x7ef   :  { %v749_v58 = vpop.f32.mrb[8].mxu0 }
 0x7f0   :  { %v750_v59 = vadd.f32 %v1163_v57, %v749_v58  ;;  %v1339_v60 = vpop.f32.mrb[9].mxu0 }
 0x7f2   :  { %v754_v61 = vmin.f32 %v750_v59, 0.0  ;;  %vm753_vm9 = vcmp.gt.f32.partialorder %v750_v59, 0.0 }
 0x7f4   :  { %v755_v63 = vmul.f32 1.442695, %v754_v61 }
 0x7f6   :  { %1505 = vpow2.f32 %v755_v63 }
 0x7f7   :  { %1507 = vpow2.f32 %v442_v9 }
 0x7f8   :  { %1509 = vrcp.f32 %v763_v11 }
 0x7f9   :  { %1511 = vpow2.f32 %v440_v12 }
 0x800   :  { %v1506_v0 = vpop.eup %1505 }
 0x801   :  { %v1166_v1 = vadd.f32 -1.0, %v1506_v0  ;;  %v1508_v13 = vpop.eup %1507 }
 0x802   :  { %v1510_v14 = vpop.eup %1509  ;;  %v1161_v16 = vadd.f32 -1.0, %v1508_v13 }
 0x803   :  { %v758_v62 = vsel %vm753_vm9, %v750_v59, %v1166_v1  ;;  %v1512_v17 = vpop.eup %1511 }
 0x804   :  { %1341 = vmatpush3.msk.msra.mxu0 %vm679_vm5, %v758_v62  ;;  %v1844_v21 = vsel %vm437_vm10, %v433_v5, %v1161_v16  ;;  %v1160_v22 = vadd.f32 -1.0, %v1512_v17 }
 0x805   :  { %1343 = vmatmul.mubr.msk.f32.vlgmr.msra.gmra.mrb[10].mxu0 %vm675_vm8, %v759_v55  ;;  %1345 = vmatprep.subr.msk.mxu0 %vm679_vm5, %v758_v62  ;;  %v1048_v55 = vld [vmem:[#allocation7 + $0x78] sm:$0xff] }
 0x806   :  { %1346 = vmatpush3.msk.msra.mxu0 %vm679_vm5, %v758_v62  ;;  %1347 = vmatprep.mubr.msk.f32.mxu0 %vm675_vm8, %v1818_v2  ;;  %v446_v25 = vsel %vm436_vm11, %v428_v7, %v1160_v22  ;;  %v1478_v56 = vpack.c.bf16 %v1048_v55, %v1047_v54 }
 0x808   :  { %1479 = vmatprep.subr.bf16.mxu1 %v1478_v56 }
 0x809   :  { %1348 = vmatmul.mubr.msk.f32.vlgmr.msra.gmra.mrb[12].mxu0 %vm675_vm8, %v1829_v3  ;;  %1481 = vmatpush3.bf16.msra.mxu1 %v1478_v56 }
 0x80a   :  { %1352 = vmatprep.mubr.msk.f32.mxu0 %vm675_vm8, %v1818_v2 }
 0x8d8   :  { %v836_v15 = vpop.f32.mrb[10].mxu0 }
 0x8d9   :  { %v841_v18 = vmul.f32 %v1510_v14, %v836_v15  ;;  %v1344_v19 = vpop.f32.mrb[11].mxu0 }
 0x8db   :  { %1350 = vmatprep.subr.msk.mxu0 %vm679_vm5, %v841_v18 }
 0x8dc   :  { %v1841_v20 = vpop.f32.mrb[12].mxu0  ;;  %1351 = vmatpush3.msk.msra.mxu0 %vm679_vm5, %v841_v18 }
 0x8dd   :  { %v1846_v23 = vpop.f32.mrb[13].mxu0  ;;  %1353 = vmatmul.mubr.msk.f32.vlgmr.msra.gmra.mrb[14].mxu0 %vm675_vm8, %v1829_v3  ;;  %v1010_v24 = vmul.f32 %v1841_v20, %v1844_v21 }
 0x8de   :  { %v1009_v26 = vmul.f32 %v1846_v23, %v446_v25 }
 0x8df   :  { %1013 = vadd.xlane.f32.xlu0 %v1010_v24 }
 0x8e3   :  { %1011 = vadd.xlane.f32.xlu0 %v1009_v26 }
 0x96c   :  { %v1014_v57 = vpop.xlane.xlu0 %1013 }
 0x96d   :  { %v1022_v59 = vmul.f32 %v1841_v20, %v1014_v57 }
 0x96f   :  { %v1024_v61 = vadd.f32 %v1022_v59, %v1844_v21 }
 0x970   :  { %v1012_v58 = vpop.xlane.xlu0 %1011 }
 0x971   :  { %v1021_v63 = vmul.f32 %v1012_v58, %v1846_v23 }
 0x973   :  { %v1023_v2 = vadd.f32 %v1021_v63, %v446_v25 }
 0x9b0   :  { %v1354_v44 = vpop.f32.mrb[14].mxu0 }
 0x9b1   :  { %v994_v45 = vpop.f32.mrb[15].mxu0  ;;  %v1016_v46 = vmul.f32 %v1354_v44, %v1844_v21 }
 0x9b2   :  { %v1015_v47 = vmul.f32 %v994_v45, %v446_v25 }
 0x9b3   :  { %1019 = vadd.xlane.f32.xlu0 %v1016_v46 }
 0x9b7   :  { %1017 = vadd.xlane.f32.xlu0 %v1015_v47 }
 0x9bb   :  { %1004 = vadd.xlane.f32.xlu0 %v1003_v48 }
 0x9bf   :  { %1007 = vadd.xlane.f32.xlu0 %v1006_v49 }
 0xa40   :  { %v1020_v60 = vpop.xlane.xlu0 %1019 }
 0xa41   :  { %v1026_v0 = vmul.f32 %v1354_v44, %v1020_v60 }
 0xa43   :  { %v1028_v1 = vadd.f32 %v1026_v0, %v1024_v61 }
 0xa44   :  { %v1018_v62 = vpop.xlane.xlu0 %1017 }
 0xa45   :  { %v1025_v3 = vmul.f32 %v1018_v62, %v994_v45 }
 0xa47   :  { %v1027_v4 = vadd.f32 %v1025_v3, %v1023_v2 }
 0xa48   :  { %v1005_v5 = vpop.xlane.xlu0 %1004 }
 0xa49   :  { %v1029_v6 = vmul.f32 %v1027_v4, %v1005_v5 }
 0xa4b   :  { %1031 = vst [vmem:[#allocation8] sm:$0xff] %v1029_v6  ;;  %1387 = vmatprep.mubr.f32.mxu1 %v1029_v6 }
 0xa4c   :  { %v1008_v7 = vpop.xlane.xlu0 %1007 }
 0xa4d   :  { %v1030_v8 = vmul.f32 %v1028_v1, %v1008_v7 }
 0xa4f   :  { %1032 = vst [vmem:[#allocation8 + $0x8] sm:$0xff] %v1030_v8  ;;  %1388 = vmatmul.mubr.f32.vlgmr.msra.gmra.mrb[2].mxu1 %v1030_v8 }
 0xa50   :  { %1590 = shalt.err (!%p1587_p0)
}
 0xa51   :  { %s1591_s20 = scalar_lea.hbm %s1900_s15, 256 }
 0xa52   :  { %p1592_p1 = scmp.ne.s32.totalorder %s1900_s15, %s1591_s20  ;;  %p1595_p2 = scmp.lt.u32.totalorder %s1591_s20, %s1900_s15 }
 0xa54   :  { %p1597_p3 = pnand %p1595_p2, %p1592_p1 }
 0xa56   :  { %1600 = shalt.err (!%p1597_p3)
}
 0xa57   :  { %1146 = dma.vmem_to_hbm [thread:$0]  %s1141_s11, 256, %s1900_s15, [#allocation4], %s1609_s30, %s1609_s30, %s1610_s16  }
 0xa58   :  { %v1175_v9 = vld [vmem:[%s1898_s13] ss:$0 sm:$0xff] }
 0xb22   :  { %v1389_v10 = vpop.f32.mrb[2].mxu1 }
 0xb23   :  { %v1128_v11 = vadd.f32 %v1389_v10, %v1175_v9  ;;  %v1122_v12 = vpop.f32.mrb[3].mxu1 }
 0xb24   :  { %v1123_v13 = vadd.f32 %v1175_v9, %v1122_v12 }
 0xb25   :  { %1132 = vst [vmem:[%s1899_s14 + $0x8] sm:$0xff] %v1128_v11 }
 0xb26   :  { %1131 = vst [vmem:[%s1899_s14] sm:$0xff] %v1123_v13 }
 0xb27   :  { %1605 = dma.done.wait [#allocation4], 256  }
 0xb28   :  { %1606 = vsyncadd [#allocation4], 4294967040 }
 0xb29   :  { %1152 = vsyncpa [#allocation3], 1 }
 0xb2a   :  { %1153 = vsyncpa [#allocation6], 1 }
 0xb2b   :  { %1154 = vsyncpa [#allocation4], 1 }

</bundles_post_ra>
